<compile_context>
chip_gen: v5e
topology: v5e:2x2
jax: 0.10.0
libtpu: 0.0.40
codegen_flags: <defaults>
</compile_context>

<pallas_src>
import math

import jax
import jax.numpy as jnp
from jax.experimental import pallas as pl
from jax.experimental.pallas import tpu as pltpu


def _dimred_kernel(x_ref, w_ref, b_ref, o_ref):
    # x_ref: (TL, Kin)   row tile of lane-packed inputs
    # w_ref: (Kin, Kout) block-diagonal folded weight (pre-transposed), resident
    # b_ref: (1, Kout)   folded bias (conv bias * bn_scale + bn_shift), resident
    # o_ref: (TL, Kout)  lane-dense output tile (bf16 store, f32 epilogue)
    y = jnp.dot(x_ref[...], w_ref[...], preferred_element_type=jnp.float32)
    y = y + b_ref[...]
    o_ref[...] = jnp.maximum(y, 0.0).astype(o_ref.dtype)


def fold_dim_reduction_params(w, bias, gamma, beta, running_mean, running_var,
                              *, rows, eps=1e-5, max_weight_bytes=4 << 20):
    """Fold eval-mode BN + conv bias into (w_big, b_big) and pick pack factor k.

    Call once per weight set (invariant across forward calls in eval mode).
    w: (Cout, Cin) conv weight; returns (w_big (k*Cin, k*Cout), b_big (1, k*Cout), k).
    """
    Cout, Cin = w.shape

    scale = gamma / jnp.sqrt(running_var + eps)                 # (Cout,)
    w_fold = (w * scale[:, None]).T                             # (Cin, Cout)
    b_fold = bias * scale + (beta - running_mean * scale)       # (Cout,)

    # Smallest k that makes the packed output lane-dense (k*Cout % 128 == 0).
    base = 128 // math.gcd(Cout, 128)

    def wbytes(kk):
        return (kk * Cin) * (kk * Cout) * 4

    if wbytes(base) > max_weight_bytes:
        k = 1   # pathological channel counts: skip packing (masked stores)
    else:
        k = base
        # Grow k (multiples of base) to densify input lanes (Kin >= 128), while
        # keeping >= 16 packed rows (so the grid can still shard across v7x's
        # two TensorCores) and the block-diagonal weight small.
        while (k * Cin < 128
               and k + base <= 128
               and rows // (k + base) >= 16
               and wbytes(k + base) <= max_weight_bytes):
            k += base

    if k > 1:
        w_big = jnp.kron(jnp.eye(k, dtype=w_fold.dtype), w_fold)   # (k*Cin, k*Cout)
        b_big = jnp.tile(b_fold, k)[None, :]                       # (1, k*Cout)
    else:
        w_big = w_fold
        b_big = b_fold[None, :]
    return w_big, b_big, k


def dim_reduction_apply(x, w_big, b_big, k, Cout, *, out_dtype=jnp.bfloat16,
                        max_tile_bytes=8 << 20):
    """x: (B, L, Cin) -> (B, L, Cout) using pre-folded parameters."""
    B, L, Cin = x.shape
    Kin, Kout = w_big.shape
    assert Kin == k * Cin and Kout == k * Cout

    rows = B * L
    x2 = x.reshape(rows, Cin)                 # free row-major reshape

    # Pad only the few (< k) rows needed to make lane packing legal.
    pad = (-rows) % k
    if pad:
        x2 = jnp.pad(x2, ((0, pad), (0, 0)))
    R = (rows + pad) // k
    x2 = x2.reshape(R, Kin)                   # k original rows packed per row

    x_bytes = jnp.dtype(x.dtype).itemsize
    o_bytes = jnp.dtype(out_dtype).itemsize
    row_bytes = Kin * x_bytes + Kout * o_bytes

    # Row tile: big enough to amortize the ~0.35 us per-grid-step overhead
    # (~several MiB of in+out traffic per step), small enough that the
    # double-buffered working set fits comfortably in v7x's 64 MiB VMEM.
    tl_max = max(8, min(8192, max_tile_bytes // max(row_bytes, 1)))
    tl_max -= tl_max % 8
    if R >= 16:
        # At least 2 steps so the "parallel" axis can shard across both v7x TCs.
        n_steps = max(2, pl.cdiv(R, tl_max))
        TL = min(tl_max, ((pl.cdiv(R, n_steps) + 7) // 8) * 8)
    else:
        TL = R                                # full-extent block (always legal)
    grid = (pl.cdiv(R, TL),)                  # non-divisible tail block is masked

    # VMEM budget derived from actual tile bytes (generous margin, < 64 MiB).
    tile_bytes = TL * row_bytes
    param_bytes = Kin * Kout * jnp.dtype(w_big.dtype).itemsize + Kout * 4
    vmem_limit = int(min(56 << 20,
                         max(16 << 20, 4 * tile_bytes + 2 * param_bytes + (2 << 20))))

    out2 = pl.pallas_call(
        _dimred_kernel,
        out_shape=jax.ShapeDtypeStruct((R, Kout), out_dtype),
        grid_spec=pltpu.PrefetchScalarGridSpec(
            num_scalar_prefetch=0,
            grid=grid,
            in_specs=[
                pl.BlockSpec((TL, Kin), lambda i: (i, 0)),
                pl.BlockSpec((Kin, Kout), lambda i: (0, 0)),
                pl.BlockSpec((1, Kout), lambda i: (0, 0)),
            ],
            out_specs=pl.BlockSpec((TL, Kout), lambda i: (i, 0)),
        ),
        compiler_params=pltpu.CompilerParams(
            dimension_semantics=("parallel",),
            vmem_limit_bytes=vmem_limit,
        ),
    )(x2, w_big, b_big)

    # Undo lane packing with a free row-major reshape; drop pack-pad rows.
    out_flat = out2.reshape(R * k, Cout)
    if pad:
        out_flat = out_flat[:rows]
    return out_flat.reshape(B, L, Cout)


def dim_reduction_forward(x, w, bias, gamma, beta, running_mean, running_var,
                          eps=1e-5, out_dtype=jnp.bfloat16):
    """Convenience one-shot path: fold params then apply."""
    B, L, _ = x.shape
    Cout = w.shape[0]
    w_big, b_big, k = fold_dim_reduction_params(
        w, bias, gamma, beta, running_mean, running_var, rows=B * L, eps=eps)
    return dim_reduction_apply(x, w_big, b_big, k, Cout, out_dtype=out_dtype)


def _reference(x, w, bias, gamma, beta, running_mean, running_var, eps=1e-5):
    # Pure-JAX f32 reference matching the PyTorch forward (eval-mode BN).
    y = jnp.einsum("blc,oc->blo", x, w) + bias[None, None, :]
    y = (y - running_mean) / jnp.sqrt(running_var + eps) * gamma + beta
    return jnp.maximum(y, 0.0)


if __name__ == "__main__":
    B, L, Cin, Cout = 2, 16, 4, 32

    key = jax.random.PRNGKey(0)
    kx, kw, kb = jax.random.split(key, 3)

    x = jax.random.normal(kx, (B, L, Cin), dtype=jnp.float32)

    # Parameters follow nn.Conv2d(1, Cout, (1, Cin)) and nn.BatchNorm1d(Cout).
    w = jax.random.normal(kw, (Cout, Cin), dtype=jnp.float32) * 0.1
    bias = jax.random.normal(kb, (Cout,), dtype=jnp.float32) * 0.1
    gamma = 1.0 + 0.05 * jnp.arange(Cout, dtype=jnp.float32)
    beta = 0.01 * jnp.arange(Cout, dtype=jnp.float32)
    running_mean = 0.02 * jnp.arange(Cout, dtype=jnp.float32)
    running_var = 1.0 + 0.03 * jnp.arange(Cout, dtype=jnp.float32)

    # Folding is hoisted out of the forward path (invariant in eval mode).
    w_big, b_big, k = fold_dim_reduction_params(
        w, bias, gamma, beta, running_mean, running_var, rows=B * L)
    w_big, b_big = jax.block_until_ready((w_big, b_big))

    out = dim_reduction_apply(x, w_big, b_big, k, Cout)
    out = jax.block_until_ready(out)

    ref = _reference(x, w, bias, gamma, beta, running_mean, running_var)
    assert out.shape == (B, L, Cout)
    assert out.dtype == jnp.bfloat16
    # Accumulation and the bias+relu epilogue are f32; the only extra error vs.
    # the f32 reference is the final bf16 store (plus BN-fold rounding reorder).
    assert jnp.allclose(out.astype(jnp.float32), ref, atol=1e-2, rtol=1e-2), \
        "mismatch vs reference"

    print("KERNEL_OK")
</pallas_src>

<mosaic_0001>
module attributes {stable_mosaic.version = 11 : i64} {
  func.func @_dimred_kernel(%arg0: i32, %arg1: memref<8x16xf32, #tpu.memory_space<vmem>>, %arg2: memref<16x128xf32, #tpu.memory_space<vmem>>, %arg3: memref<1x128xf32, #tpu.memory_space<vmem>>, %arg4: memref<8x128xbf16, #tpu.memory_space<vmem>>) attributes {dimension_semantics = [#tpu.dimension_semantics<parallel>], iteration_bounds = array<i64: 1>, scalar_prefetch = 0 : i64, scratch_operands = 0 : i64, tpu.core_type = #tpu.core_type<tc>, window_params = [{transform_indices = @transform_0, window_bounds = array<i64: 8, 16>}, {pipeline_mode = #tpu.pipeline_mode<synchronous>, transform_indices = @transform_1, window_bounds = array<i64: 16, 128>}, {pipeline_mode = #tpu.pipeline_mode<synchronous>, transform_indices = @transform_2, window_bounds = array<i64: 1, 128>}, {transform_indices = @transform_3, window_bounds = array<i64: 8, 128>}]} {
    %c0 = arith.constant 0 : index
    %c0_0 = arith.constant 0 : index
    %0 = vector.load %arg1[%c0, %c0_0] : memref<8x16xf32, #tpu.memory_space<vmem>>, vector<8x16xf32>
    %c0_1 = arith.constant 0 : index
    %c0_2 = arith.constant 0 : index
    %1 = vector.load %arg2[%c0_1, %c0_2] : memref<16x128xf32, #tpu.memory_space<vmem>>, vector<16x128xf32>
    %cst = arith.constant dense<0.000000e+00> : vector<8x128xf32>
    %2 = tpu.matmul %0, %1, %cst {dimension_numbers = #tpu.dot_dimension_numbers<[1], [0], [0], [1], [0, 0, 1, 1], [], []>} : vector<8x16xf32>, vector<16x128xf32>, vector<8x128xf32> -> vector<8x128xf32>
    %c0_3 = arith.constant 0 : index
    %c0_4 = arith.constant 0 : index
    %3 = vector.load %arg3[%c0_3, %c0_4] : memref<1x128xf32, #tpu.memory_space<vmem>>, vector<1x128xf32>
    %4 = vector.broadcast %3 : vector<1x128xf32> to vector<8x128xf32>
    %5 = arith.addf %2, %4 : vector<8x128xf32>
    %cst_5 = arith.constant 0.000000e+00 : f32
    %6 = vector.broadcast %cst_5 : f32 to vector<8x128xf32>
    %7 = arith.maximumf %5, %6 : vector<8x128xf32>
    %8 = arith.truncf %7 : vector<8x128xf32> to vector<8x128xbf16>
    %c0_6 = arith.constant 0 : index
    %c0_7 = arith.constant 0 : index
    %9 = vector.load %arg4[%c0_6, %c0_7] : memref<8x128xbf16, #tpu.memory_space<vmem>>, vector<8x128xbf16>
    tpu.vector_store %arg4[%c0_6, %c0_7], %8 {strides = array<i32>} : memref<8x128xbf16, #tpu.memory_space<vmem>>, vector<8x128xbf16>,
    return
  }
  func.func @transform_0(%arg0: i32) -> (i32, i32) {
    %c0_i32 = arith.constant 0 : i32
    %c0_i32_0 = arith.constant 0 : i32
    return %arg0, %c0_i32 : i32, i32
  }
  func.func @transform_1(%arg0: i32) -> (i32, i32) {
    %c0_i32 = arith.constant 0 : i32
    %c0_i32_0 = arith.constant 0 : i32
    %c0_i32_1 = arith.constant 0 : i32
    return %c0_i32, %c0_i32_0 : i32, i32
  }
  func.func @transform_2(%arg0: i32) -> (i32, i32) {
    %c0_i32 = arith.constant 0 : i32
    %c0_i32_0 = arith.constant 0 : i32
    %c0_i32_1 = arith.constant 0 : i32
    return %c0_i32, %c0_i32_0 : i32, i32
  }
  func.func @transform_3(%arg0: i32) -> (i32, i32) {
    %c0_i32 = arith.constant 0 : i32
    %c0_i32_0 = arith.constant 0 : i32
    return %arg0, %c0_i32 : i32, i32
  }
}

</mosaic_0001>

<bundles_post_ra>
// kernel: tpu_custom_call.1
= control target key start
LH: loop header
LB: loop body
LE: loop exit
PB: predicated region body
PF: predicated region fallthrough
CT: control target
= control target key end

     0   :  { %8 = vsyncpa [#allocation3], 0  ;;  %s219_s0 = inlined_call_operand.hbm [shape: f32[8,16], index: 0, kind: input, shape index: {}]   ;;  %s220_s1 = inlined_call_operand.hbm [shape: f32[16,128], index: 1, kind: input, shape index: {}]   ;;  %s221_s2 = inlined_call_operand.vmem [shape: f32[1,128], index: 2, kind: input, shape index: {}]   ;;  %s222_s3 = inlined_call_operand.hbm [shape: bf16[8,128], index: 3, kind: output, shape index: {}]  }
   0x1   :  { %9 = vsyncpa [#allocation6], 0 }
   0x2   :  { %10 = vsyncpa [#allocation4], 0  ;;  %s16_s14 = sshll.u32 %s219_s0, 4  ;;  %s182_s15 = smov [#allocation2]   ;;  %s17_s14 = int_to_ptr.hbm [resolvable:$true] %s16_s14 }
   0x3   :  { %s18_s16 = sshll.u32 %s182_s15, 4  ;;  %s26_s19 = sshll.u32 %s220_s1, 4  ;;  %s19_s16 = int_to_ptr.vmem [resolvable:$true] %s18_s16  ;;  %s27_s19 = int_to_ptr.hbm [resolvable:$true] %s26_s19 }
   0x4   :  { %21 = dma.hbm_to_vmem [thread:$0]  %s17_s14, 128, %s19_s16, [#allocation3]  }
   0x5   :  { %s183_s20 = smov [#allocation5]   ;;  %s184_s22 = smov 128  }
   0x6   :  { %s28_s21 = sshll.u32 %s183_s20, 4  ;;  %s185_s23 = smov 8   ;;  %s29_s21 = int_to_ptr.vmem [resolvable:$true] %s28_s21 }
   0x7   :  { %34 = dma.hbm_to_vmem [thread:$0]  %s27_s19, 256, %s29_s21, [#allocation6], %s184_s22, %s184_s22, %s185_s23  }
   0x8   :  { %176 = dma.done.wait [#allocation3], 128  }
   0x9   :  { %177 = vsyncadd [#allocation3], 4294967168 }
   0xa   :  { %178 = dma.done.wait [#allocation6], 256  }
   0xb   :  { %179 = vsyncadd [#allocation6], 4294967040  ;;  %v47_v0 = vld [vmem:[#allocation5 + $0x8] sm:$0xff]  ;;  %v46_v1 = vld [vmem:[#allocation5] sm:$0xff]  ;;  %vm52_vm0 = vcmask 130048   ;;  %s186_s24 = smov [#allocation7]  }
   0xc   :  { %70 = vmatpush.msra.mxu0 %v47_v0  ;;  %v45_v2 = vld [vmem:[#allocation2] sm:$0xff]  ;;  %s84_s25 = sshll.u32 %s186_s24, 4  ;;  %s86_s28 = sshll.u32 %s222_s3, 4  ;;  %s85_s25 = int_to_ptr.vmem [resolvable:$true] %s84_s25  ;;  %s87_s28 = int_to_ptr.hbm [resolvable:$true] %s86_s28 }
   0xd   :  { %v103_v3 = vld [vmem:[%s221_s2] ss:$0 sm:$0xff] }
   0xe   :  { %71 = vmatpush.msra.mxu0 %v46_v1 }
   0xf   :  { %97 = vmatmul.msk.f32.vlgmr.msra.gmra.mxu0 %vm52_vm0, %v45_v2 }
  0x8c   :  { %v73_v4 = vpop.f32.mrf.mxu0 }
  0x8d   :  { %v74_v5 = vadd.f32 %v103_v3, %v73_v4 }
  0x8f   :  { %v76_v6 = vmax.f32 %v74_v5, 0.0 }
  0x91   :  { %v77_v7 = vpack.c.bf16 %v76_v6, %v76_v6 }
  0x93   :  { %78 = vst [vmem:[#allocation7] sm:$0xf] %v77_v7 }
  0x94   :  { %89 = dma.vmem_to_hbm [thread:$0]  %s85_s25, 64, %s87_s28, [#allocation4]  }
  0x95   :  { %180 = dma.done.wait [#allocation4], 64  }
  0x96   :  { %181 = vsyncadd [#allocation4], 4294967232 }
  0x97   :  { %94 = vsyncpa [#allocation3], 1 }
  0x98   :  { %95 = vsyncpa [#allocation6], 1 }
  0x99   :  { %96 = vsyncpa [#allocation4], 1 }

</bundles_post_ra>
